<compile_context>
chip_gen: v7x
topology: tpu7x:2x2x1
jax: 0.10.0
libtpu: 0.0.40
codegen_flags: <defaults>
</compile_context>

<pallas_src>
import jax
import jax.numpy as jnp
from jax import lax
from jax.experimental import pallas as pl
from jax.experimental.pallas import tpu as pltpu

_BN_EPS = 1e-5
# Contract dim 1 of x (B, K) with dim 1 of w (N, K)  ->  (B, N); i.e. x @ w.T
# without materializing a transpose.
_CONTRACT_T = (((1,), (1,)), ((), ()))


# --------------------------------------------------------------------------
# Kernels
# --------------------------------------------------------------------------
def _fused_kernel(x_ref, w1_ref, w2_ref, g1_ref, b1_ref, o_ref):
    """Whole forward in one block (small / non-lane-aligned D)."""
    # x: (B, D) bf16; w1/w2: (D, D) bf16 in (out, in) layout; g1/b1: (1, D) f32.
    h = lax.dot_general(x_ref[...], w1_ref[...], _CONTRACT_T,
                        preferred_element_type=jnp.float32)           # (B, D) f32

    # bn1: affine, batch stats, one pass (var = E[h^2] - mean^2), gamma folded.
    m1 = jnp.mean(h, axis=0, keepdims=True)
    v1 = jnp.mean(h * h, axis=0, keepdims=True) - m1 * m1
    scale1 = g1_ref[...] * lax.rsqrt(v1 + _BN_EPS)
    shift1 = b1_ref[...] - m1 * scale1
    h = jnp.maximum(h * scale1 + shift1, 0.0)                         # ReLU (f32)

    # w2: only the matmul operand is bf16; accumulation stays f32.
    y = lax.dot_general(h.astype(w2_ref.dtype), w2_ref[...], _CONTRACT_T,
                        preferred_element_type=jnp.float32)           # (B, D) f32

    # bn2: non-affine, batch stats.
    m2 = jnp.mean(y, axis=0, keepdims=True)
    v2 = jnp.mean(y * y, axis=0, keepdims=True) - m2 * m2
    o_ref[...] = ((y - m2) * lax.rsqrt(v2 + _BN_EPS)).astype(o_ref.dtype)


def _layer1_kernel(x_ref, w1_ref, g1_ref, b1_ref, h_ref):
    """h[:, slab] = relu(bn1(x @ w1[slab].T)).  BN stats are per-feature over
    the batch, so they are exact inside an output-feature slab."""
    h = lax.dot_general(x_ref[...], w1_ref[...], _CONTRACT_T,
                        preferred_element_type=jnp.float32)           # (B, TN) f32
    m = jnp.mean(h, axis=0, keepdims=True)
    v = jnp.mean(h * h, axis=0, keepdims=True) - m * m
    scale = g1_ref[...] * lax.rsqrt(v + _BN_EPS)
    shift = b1_ref[...] - m * scale
    h_ref[...] = jnp.maximum(h * scale + shift, 0.0).astype(h_ref.dtype)


def _layer2_kernel(h_ref, w2_ref, o_ref):
    """out[:, slab] = bn2(h @ w2[slab].T)."""
    y = lax.dot_general(h_ref[...], w2_ref[...], _CONTRACT_T,
                        preferred_element_type=jnp.float32)           # (B, TN) f32
    m = jnp.mean(y, axis=0, keepdims=True)
    v = jnp.mean(y * y, axis=0, keepdims=True) - m * m
    o_ref[...] = ((y - m) * lax.rsqrt(v + _BN_EPS)).astype(o_ref.dtype)


# --------------------------------------------------------------------------
# Wrapper
# --------------------------------------------------------------------------
def _vmem_budget(estimate_bytes):
    """Estimated per-step residency + headroom, clamped to stay inside every
    chip's physical VMEM (v7x: 64 MiB per TensorCore)."""
    return int(min(max(2 * estimate_bytes + (4 << 20), 16 << 20), 60 << 20))


def projection_forward(x, w1, w2, gamma1, beta1):
    """Forward of `Projection` with train-mode BatchNorm batch statistics.

    x           : (B, D) activations.
    w1, w2      : (D, D) PyTorch-layout Linear weights (out_features, in_features);
                  passed straight through, no transpose.
    gamma1, beta1: (D,) bn1 affine parameters.
    """
    B, D = x.shape

    # bf16 MXU operands (ideally the params are already stored bf16 upstream);
    # BN statistics / element-wise math stay f32 inside the kernels.
    xb = jnp.asarray(x, jnp.bfloat16)
    w1b = jnp.asarray(w1, jnp.bfloat16)
    w2b = jnp.asarray(w2, jnp.bfloat16)
    g1 = jnp.asarray(gamma1, jnp.float32).reshape(1, D)
    b1 = jnp.asarray(beta1, jnp.float32).reshape(1, D)

    # Feature-slab width: 256 fills the 256-wide MXU on v6e/v7x, 128 otherwise.
    tn = 256 if (D % 256 == 0 and D >= 512) else 128
    use_tiled = (D % tn == 0) and (D // tn >= 2)

    if not use_tiled:
        # Small / non-lane-aligned D (e.g. the shipped D=32): one fused block.
        # (D < 128 means partially-masked lanes; pad or batch heads upstream
        #  if this ever becomes hot.)
        est = (2 * D * D * 2            # w1 + w2 (bf16)
               + B * D * 2              # x (bf16)
               + B * D * 4              # output (f32)
               + 8 * B * D * 4          # f32 temporaries
               + 8 * D * 4)             # gamma/beta + stats rows
        full = lambda shape: pl.BlockSpec(shape, lambda: (0,) * len(shape))
        return pl.pallas_call(
            _fused_kernel,
            out_shape=jax.ShapeDtypeStruct((B, D), jnp.float32),
            in_specs=[full((B, D)), full((D, D)), full((D, D)),
                      full((1, D)), full((1, D))],
            out_specs=full((B, D)),
            compiler_params=pltpu.CompilerParams(
                vmem_limit_bytes=_vmem_budget(est)),
        )(xb, w1b, w2b, g1, b1)

    # ---------------- feature-slab grid (lane-dense D) ----------------------
    n_slabs = D // tn
    est_l1 = (2 * B * D * 2 + 2 * tn * D * 2 + 2 * B * tn * 2
              + 6 * B * tn * 4 + 8 * tn * 4)
    est_l2 = (2 * B * D * 2 + 2 * tn * D * 2 + 2 * B * tn * 4
              + 6 * B * tn * 4)
    cp = pltpu.CompilerParams(
        # slab axis is independent -> v7x megacore splits it across its 2 TCs
        dimension_semantics=("parallel",),
        vmem_limit_bytes=_vmem_budget(max(est_l1, est_l2)),
    )

    # Layer 1: h = relu(bn1(x @ w1.T)), produced slab-by-slab (bf16, since it
    # is only ever consumed as a bf16 matmul operand by layer 2).
    h = pl.pallas_call(
        _layer1_kernel,
        out_shape=jax.ShapeDtypeStruct((B, D), jnp.bfloat16),
        grid=(n_slabs,),
        in_specs=[
            pl.BlockSpec((B, D), lambda j: (0, 0)),    # x: full, constant block
            pl.BlockSpec((tn, D), lambda j: (j, 0)),   # w1 output-row slab
            pl.BlockSpec((1, tn), lambda j: (0, j)),   # gamma slab
            pl.BlockSpec((1, tn), lambda j: (0, j)),   # beta slab
        ],
        out_specs=pl.BlockSpec((B, tn), lambda j: (0, j)),
        compiler_params=cp,
    )(xb, w1b, g1, b1)

    # Layer 2: out = bn2(h @ w2.T), again slab-by-slab.
    out = pl.pallas_call(
        _layer2_kernel,
        out_shape=jax.ShapeDtypeStruct((B, D), jnp.float32),
        grid=(n_slabs,),
        in_specs=[
            pl.BlockSpec((B, D), lambda j: (0, 0)),    # h: full, constant block
            pl.BlockSpec((tn, D), lambda j: (j, 0)),   # w2 output-row slab
        ],
        out_specs=pl.BlockSpec((B, tn), lambda j: (0, j)),
        compiler_params=cp,
    )(h, w2b)
    return out


# --------------------------------------------------------------------------
# Pure-JAX reference & test
# --------------------------------------------------------------------------
def _reference(x, w1, w2, gamma1, beta1, matmul_dtype=jnp.float32):
    """Reference of the PyTorch forward (train-mode BN).  With
    matmul_dtype=bfloat16 it mirrors the kernel's mixed-precision policy
    (bf16 MXU operands, f32 accumulation, f32 BN statistics)."""
    h = lax.dot_general(x.astype(matmul_dtype), w1.astype(matmul_dtype),
                        _CONTRACT_T, preferred_element_type=jnp.float32)
    m = h.mean(0)
    v = (h * h).mean(0) - m * m
    h = (h - m) * lax.rsqrt(v + _BN_EPS) * gamma1 + beta1
    h = jnp.maximum(h, 0.0)
    y = lax.dot_general(h.astype(matmul_dtype), w2.astype(matmul_dtype),
                        _CONTRACT_T, preferred_element_type=jnp.float32)
    m2 = y.mean(0)
    v2 = (y * y).mean(0) - m2 * m2
    return (y - m2) * lax.rsqrt(v2 + _BN_EPS)


def _run_case(B, D, key):
    kx, k1, k2 = jax.random.split(key, 3)
    x = jax.random.normal(kx, (B, D), dtype=jnp.float32)
    bound = 1.0 / (D ** 0.5)
    w1 = jax.random.uniform(k1, (D, D), jnp.float32, -bound, bound)   # (out, in)
    w2 = jax.random.uniform(k2, (D, D), jnp.float32, -bound, bound)   # (out, in)
    gamma1 = jnp.ones((D,), jnp.float32)   # PyTorch BatchNorm1d default affine init
    beta1 = jnp.zeros((D,), jnp.float32)

    out = jax.block_until_ready(projection_forward(x, w1, w2, gamma1, beta1))
    assert out.shape == (B, D)

    # Tight check against a reference using the same bf16-operand / f32-accum
    # mixed precision as the kernel.
    ref_bf16 = _reference(x, w1, w2, gamma1, beta1, matmul_dtype=jnp.bfloat16)
    assert jnp.allclose(out, ref_bf16, atol=2e-3, rtol=2e-3), (
        f"mismatch vs bf16-consistent reference at B={B}, D={D}")

    # Loose check against the full-f32 PyTorch-semantics reference (bounds the
    # bf16 operand rounding error).
    ref_f32 = _reference(x, w1, w2, gamma1, beta1, matmul_dtype=jnp.float32)
    assert jnp.allclose(out, ref_f32, atol=6e-2, rtol=6e-2), (
        f"mismatch vs f32 reference at B={B}, D={D}")


if __name__ == "__main__":
    # Shipped toy shape (batch=8, pts_embedding=32): fused single-block kernel.
    _run_case(8, 32, jax.random.PRNGKey(0))
    # Lane-dense shape exercising the feature-slab grid path (2 slabs of 128).
    _run_case(16, 256, jax.random.PRNGKey(1))
    print("KERNEL_OK")
</pallas_src>

<mosaic_0001>
module attributes {stable_mosaic.version = 11 : i64} {
  func.func @_fused_kernel(%arg0: memref<8x32xbf16, #tpu.memory_space<vmem>>, %arg1: memref<32x32xbf16, #tpu.memory_space<vmem>>, %arg2: memref<32x32xbf16, #tpu.memory_space<vmem>>, %arg3: memref<1x32xf32, #tpu.memory_space<vmem>>, %arg4: memref<1x32xf32, #tpu.memory_space<vmem>>, %arg5: memref<8x32xf32, #tpu.memory_space<vmem>>) attributes {dimension_semantics = [], scalar_prefetch = 0 : i64, scratch_operands = 0 : i64, tpu.core_type = #tpu.core_type<tc>} {
    %c0 = arith.constant 0 : index
    %c0_0 = arith.constant 0 : index
    %0 = vector.load %arg0[%c0, %c0_0] : memref<8x32xbf16, #tpu.memory_space<vmem>>, vector<8x32xbf16>
    %c0_1 = arith.constant 0 : index
    %c0_2 = arith.constant 0 : index
    %1 = vector.load %arg1[%c0_1, %c0_2] : memref<32x32xbf16, #tpu.memory_space<vmem>>, vector<32x32xbf16>
    %cst = arith.constant dense<0.000000e+00> : vector<8x32xf32>
    %2 = tpu.matmul %0, %1, %cst {dimension_numbers = #tpu.dot_dimension_numbers<[1], [1], [0], [0], [0, 0, 1, 0], [], []>} : vector<8x32xbf16>, vector<32x32xbf16>, vector<8x32xf32> -> vector<8x32xf32>
    %cst_3 = arith.constant dense<0.000000e+00> : vector<32xf32>
    %3 = vector.multi_reduction <add>, %2, %cst_3 [0] : vector<8x32xf32> to vector<32xf32>
    %4 = vector.shape_cast %3 : vector<32xf32> to vector<1x32xf32>
    %cst_4 = arith.constant 8.000000e+00 : f32
    %5 = vector.broadcast %cst_4 : f32 to vector<1x32xf32>
    %6 = arith.divf %4, %5 : vector<1x32xf32>
    %7 = arith.mulf %2, %2 : vector<8x32xf32>
    %cst_5 = arith.constant dense<0.000000e+00> : vector<32xf32>
    %8 = vector.multi_reduction <add>, %7, %cst_5 [0] : vector<8x32xf32> to vector<32xf32>
    %9 = vector.shape_cast %8 : vector<32xf32> to vector<1x32xf32>
    %cst_6 = arith.constant 8.000000e+00 : f32
    %10 = vector.broadcast %cst_6 : f32 to vector<1x32xf32>
    %11 = arith.divf %9, %10 : vector<1x32xf32>
    %12 = arith.mulf %6, %6 : vector<1x32xf32>
    %13 = arith.subf %11, %12 : vector<1x32xf32>
    %c0_7 = arith.constant 0 : index
    %c0_8 = arith.constant 0 : index
    %14 = vector.load %arg3[%c0_7, %c0_8] : memref<1x32xf32, #tpu.memory_space<vmem>>, vector<1x32xf32>
    %cst_9 = arith.constant 9.99999974E-6 : f32
    %15 = vector.broadcast %cst_9 : f32 to vector<1x32xf32>
    %16 = arith.addf %13, %15 : vector<1x32xf32>
    %17 = math.rsqrt %16 : vector<1x32xf32>
    %18 = arith.mulf %14, %17 : vector<1x32xf32>
    %c0_10 = arith.constant 0 : index
    %c0_11 = arith.constant 0 : index
    %19 = vector.load %arg4[%c0_10, %c0_11] : memref<1x32xf32, #tpu.memory_space<vmem>>, vector<1x32xf32>
    %20 = arith.mulf %6, %18 : vector<1x32xf32>
    %21 = arith.subf %19, %20 : vector<1x32xf32>
    %22 = vector.broadcast %18 : vector<1x32xf32> to vector<8x32xf32>
    %23 = arith.mulf %2, %22 : vector<8x32xf32>
    %24 = vector.broadcast %21 : vector<1x32xf32> to vector<8x32xf32>
    %25 = arith.addf %23, %24 : vector<8x32xf32>
    %cst_12 = arith.constant 0.000000e+00 : f32
    %26 = vector.broadcast %cst_12 : f32 to vector<8x32xf32>
    %27 = arith.maximumf %25, %26 : vector<8x32xf32>
    %28 = arith.truncf %27 : vector<8x32xf32> to vector<8x32xbf16>
    %c0_13 = arith.constant 0 : index
    %c0_14 = arith.constant 0 : index
    %29 = vector.load %arg2[%c0_13, %c0_14] : memref<32x32xbf16, #tpu.memory_space<vmem>>, vector<32x32xbf16>
    %cst_15 = arith.constant dense<0.000000e+00> : vector<8x32xf32>
    %30 = tpu.matmul %28, %29, %cst_15 {dimension_numbers = #tpu.dot_dimension_numbers<[1], [1], [0], [0], [0, 0, 1, 0], [], []>} : vector<8x32xbf16>, vector<32x32xbf16>, vector<8x32xf32> -> vector<8x32xf32>
    %cst_16 = arith.constant dense<0.000000e+00> : vector<32xf32>
    %31 = vector.multi_reduction <add>, %30, %cst_16 [0] : vector<8x32xf32> to vector<32xf32>
    %32 = vector.shape_cast %31 : vector<32xf32> to vector<1x32xf32>
    %cst_17 = arith.constant 8.000000e+00 : f32
    %33 = vector.broadcast %cst_17 : f32 to vector<1x32xf32>
    %34 = arith.divf %32, %33 : vector<1x32xf32>
    %35 = arith.mulf %30, %30 : vector<8x32xf32>
    %cst_18 = arith.constant dense<0.000000e+00> : vector<32xf32>
    %36 = vector.multi_reduction <add>, %35, %cst_18 [0] : vector<8x32xf32> to vector<32xf32>
    %37 = vector.shape_cast %36 : vector<32xf32> to vector<1x32xf32>
    %cst_19 = arith.constant 8.000000e+00 : f32
    %38 = vector.broadcast %cst_19 : f32 to vector<1x32xf32>
    %39 = arith.divf %37, %38 : vector<1x32xf32>
    %40 = arith.mulf %34, %34 : vector<1x32xf32>
    %41 = arith.subf %39, %40 : vector<1x32xf32>
    %42 = vector.broadcast %34 : vector<1x32xf32> to vector<8x32xf32>
    %43 = arith.subf %30, %42 : vector<8x32xf32>
    %cst_20 = arith.constant 9.99999974E-6 : f32
    %44 = vector.broadcast %cst_20 : f32 to vector<1x32xf32>
    %45 = arith.addf %41, %44 : vector<1x32xf32>
    %46 = math.rsqrt %45 : vector<1x32xf32>
    %47 = vector.broadcast %46 : vector<1x32xf32> to vector<8x32xf32>
    %48 = arith.mulf %43, %47 : vector<8x32xf32>
    %c0_21 = arith.constant 0 : index
    %c0_22 = arith.constant 0 : index
    %49 = vector.load %arg5[%c0_21, %c0_22] : memref<8x32xf32, #tpu.memory_space<vmem>>, vector<8x32xf32>
    tpu.vector_store %arg5[%c0_21, %c0_22], %48 {strides = array<i32>} : memref<8x32xf32, #tpu.memory_space<vmem>>, vector<8x32xf32>,
    return
  }
}

</mosaic_0001>

<bundles_post_ra>
// kernel: tpu_custom_call.1
= control target key start
LH: loop header
LB: loop body
LE: loop exit
PB: predicated region body
PF: predicated region fallthrough
CT: control target
= control target key end

     0   :  { %10 = vsyncpa [#allocation3], 0  ;;  %s519_s0 = inlined_call_operand.hbm [shape: bf16[8,32], index: 0, kind: input, shape index: {}]   ;;  %s520_s1 = inlined_call_operand.hbm [shape: bf16[32,32], index: 1, kind: input, shape index: {}]   ;;  %s521_s2 = inlined_call_operand.hbm [shape: bf16[32,32], index: 2, kind: input, shape index: {}]   ;;  %s522_s3 = inlined_call_operand.vmem [shape: f32[1,32], index: 3, kind: input, shape index: {}]   ;;  %s523_s4 = inlined_call_operand.vmem [shape: f32[1,32], index: 4, kind: input, shape index: {}]   ;;  %s524_s5 = inlined_call_operand.hbm [shape: f32[8,32], index: 5, kind: output, shape index: {}]  }
   0x1   :  { %11 = vsyncpa [#allocation6], 0 }
   0x2   :  { %12 = vsyncpa [#allocation4], 0  ;;  %s410_s18 = smov [#allocation5]   ;;  %s316_s22 = scalar_lea.hbm %s520_s1, 256 }
   0x3   :  { %s28_s19 = sshll.u32 %s410_s18, 4  ;;  %p317_p0 = scmp.ne.s32.totalorder %s520_s1, %s316_s22  ;;  %s29_s19 = int_to_ptr.vmem [resolvable:$true] %s28_s19 }
   0x4   :  { %p320_p1 = scmp.lt.u32.totalorder %s316_s22, %s520_s1 }
   0x6   :  { %p322_p2 = pnand %p320_p1, %p317_p0 }
   0x8   :  { %325 = shalt.err (!%p322_p2)
}
   0x9   :  { %s326_s27 = scalar_lea.vmem %s29_s19, 256  ;;  %p331_p4 = scmp.lt.s32.totalorder %s29_s19, %s29_s19 }
   0xa   :  { %p327_p3 = scmp.ne.s32.totalorder %s29_s19, %s326_s27  ;;  %p332_p5 = scmp.lt.s32.totalorder %s326_s27, %s326_s27 }
   0xc   :  { %p333_p6 = por %p332_p5, %p331_p4 }
   0xe   :  { %p334_p7 = pnand %p333_p6, %p327_p3 }
  0x10   :  { %337 = shalt.err (!%p334_p7)
}
  0x11   :  { %s411_s28 = smov 64   ;;  %s412_s29 = smov 4  }
  0x12   :  { %34 = dma.hbm_to_vmem [thread:$0]  %s520_s1, 256, %s29_s19, [#allocation6], %s411_s28, %s411_s28, %s412_s29  }
  0x13   :  { %s413_s7 = smov [#allocation2]   ;;  %s414_s9 = smov [#allocation7]  }
  0x14   :  { %s19_s8 = sshll.u32 %s413_s7, 4  ;;  %s40_s10 = sshll.u32 %s414_s9, 4  ;;  %s20_s8 = int_to_ptr.vmem [resolvable:$true] %s19_s8  ;;  %s41_s10 = int_to_ptr.vmem [resolvable:$true] %s40_s10 }
  0x15   :  { %s338_s13 = scalar_lea.hbm %s519_s0, 64 }
  0x16   :  { %p339_p8 = scmp.ne.s32.totalorder %s519_s0, %s338_s13  ;;  %p342_p9 = scmp.lt.u32.totalorder %s338_s13, %s519_s0 }
  0x18   :  { %p344_p10 = pnand %p342_p9, %p339_p8 }
  0x1a   :  { %347 = shalt.err (!%p344_p10)
}
  0x1b   :  { %s348_s1 = scalar_lea.vmem %s20_s8, 64  ;;  %p353_p12 = scmp.lt.s32.totalorder %s20_s8, %s20_s8 }
  0x1c   :  { %p349_p11 = scmp.ne.s32.totalorder %s20_s8, %s348_s1  ;;  %p354_p13 = scmp.lt.s32.totalorder %s348_s1, %s348_s1 }
  0x1e   :  { %p355_p0 = por %p354_p13, %p353_p12 }
  0x20   :  { %p356_p1 = pnand %p355_p0, %p349_p11 }
  0x22   :  { %359 = shalt.err (!%p356_p1)
}
  0x23   :  { %22 = dma.hbm_to_vmem [thread:$0]  %s519_s0, 64, %s20_s8, [#allocation3]  }
  0x24   :  { %s360_s22 = scalar_lea.hbm %s521_s2, 256 }
  0x25   :  { %p361_p2 = scmp.ne.s32.totalorder %s521_s2, %s360_s22  ;;  %p364_p3 = scmp.lt.u32.totalorder %s360_s22, %s521_s2 }
  0x27   :  { %p366_p4 = pnand %p364_p3, %p361_p2 }
  0x29   :  { %369 = shalt.err (!%p366_p4)
}
  0x2a   :  { %s370_s27 = scalar_lea.vmem %s41_s10, 256  ;;  %p375_p6 = scmp.lt.s32.totalorder %s41_s10, %s41_s10 }
  0x2b   :  { %p371_p5 = scmp.ne.s32.totalorder %s41_s10, %s370_s27  ;;  %p376_p7 = scmp.lt.s32.totalorder %s370_s27, %s370_s27 }
  0x2d   :  { %p377_p8 = por %p376_p7, %p375_p6 }
  0x2f   :  { %p378_p9 = pnand %p377_p8, %p371_p5 }
  0x31   :  { %381 = shalt.err (!%p378_p9)
}
  0x32   :  { %46 = dma.hbm_to_vmem [thread:$0]  %s521_s2, 256, %s41_s10, [#allocation6], %s411_s28, %s411_s28, %s412_s29  }
  0x33   :  { %404 = dma.done.wait [#allocation3], 64  }
  0x34   :  { %405 = vsyncadd [#allocation3], 4294967232 }
  0x35   :  { %406 = dma.done.wait [#allocation6], 512  }
  0x36   :  { %407 = vsyncadd [#allocation6], 4294966784  ;;  %v415_v0 = vmov 0.0   ;;  %vm416_vm0 = vmmov 0   ;;  %vm76_vm1 = vcmask 261120   ;;  %v308_v1 = vld [vmem:[#allocation5] sm:$0xff]   ;;  %v154_v34 = vlaneseq }
  0x37   :  { %284 = vmatprep.subr.bf16.mxu0 %v415_v0  ;;  %288 = vmatprep.mubr.msk.bf16.mxu0 %vm416_vm0, %v415_v0  ;;  %v81_v2 = vsel %vm76_vm1, %v308_v1, 0  ;;  %v309_v3 = vld [vmem:[#allocation5 + $0x8] sm:$0xff]   ;;  %v61_v5 = vld [vmem:[#allocation2] sm:$0xf]  ;;  %v310_v6 = vld [vmem:[#allocation7] sm:$0xff]  }
  0x38   :  { %292 = vmatprep.subr.bf16.mxu1 %v415_v0  ;;  %296 = vmatprep.mubr.msk.bf16.mxu1 %vm416_vm0, %v415_v0  ;;  %v84_v4 = vsel %vm76_vm1, %v309_v3, 0  ;;  %v187_v7 = vsel %vm76_vm1, %v310_v6, 0  ;;  %v311_v8 = vld [vmem:[#allocation7 + $0x8] sm:$0xff]   ;;  %v155_v35 = vshrl.u32 %v154_v34, 7 }
  0x39   :  { %285 = vmatpush3.bf16.xpose.msra.mxu0 %v81_v2  ;;  %293 = vmatpush3.bf16.xpose.msra.mxu1 %v187_v7  ;;  %v190_v9 = vsel %vm76_vm1, %v311_v8, 0  ;;  %v146_v36 = vld [vmem:[%s522_s3] sm:$0x1]  ;;  %s417_s3 = smov [#allocation8]  }
  0x3a   :  { %286 = vmatprep.subr.bf16.mxu0 %v415_v0  ;;  %294 = vmatprep.subr.bf16.mxu1 %v415_v0  ;;  %v156_v37 = vsub.s32 0, %v155_v35  ;;  %v150_v40 = vld [vmem:[%s523_s4] sm:$0x1]  ;;  %s262_s4 = sshll.u32 %s417_s3, 4  ;;  %s263_s4 = int_to_ptr.vmem [resolvable:$true] %s262_s4 }
  0x3b   :  { %s382_s7 = scalar_lea.vmem %s263_s4, 128  ;;  %p387_p11 = scmp.lt.s32.totalorder %s263_s4, %s263_s4 }
  0x3c   :  { %p383_p10 = scmp.ne.s32.totalorder %s263_s4, %s382_s7  ;;  %p388_p12 = scmp.lt.s32.totalorder %s382_s7, %s382_s7 }
  0x3e   :  { %p389_p13 = por %p388_p12, %p387_p11 }
  0x40   :  { %p390_p0 = pnand %p389_p13, %p383_p10 }
  0x41   :  { %287 = vmatpush3.bf16.xpose.msra.mxu0 %v84_v4  ;;  %295 = vmatpush3.bf16.xpose.msra.mxu1 %v190_v9 }
  0x48   :  { %289 = vmatmul.mubr.msk.bf16.vlgmr.msra.gmra.mrb[0].mxu0 %vm76_vm1, %v61_v5 }
 0x11b   :  { %v120_v10 = vpop.f32.mrb[0].mxu0 }
 0x11c   :  { %v126_v11 = vsel %vm76_vm1, %v120_v10, 0.0  ;;  %v135_v12 = vmul.f32 %v120_v10, %v120_v10  ;;  %v290_v13 = vpop.f32.mrb[1].mxu0 }
 0x11d   :  { %v127_v14 = vrot.slane %v126_v11, 4  ;;  %v123_v15 = vpop.f32.mrb[2].mxu0 }
 0x11e   :  { %v136_v16 = vsel %vm76_vm1, %v135_v12, 0.0  ;;  %v291_v17 = vpop.f32.mrb[3].mxu0 }
 0x11f   :  { %v128_v18 = vadd.f32 %v127_v14, %v126_v11  ;;  %v137_v19 = vrot.slane %v136_v16, 4 }
 0x121   :  { %v129_v20 = vrot.slane %v128_v18, 2  ;;  %v138_v21 = vadd.f32 %v137_v19, %v136_v16 }
 0x123   :  { %v130_v22 = vadd.f32 %v129_v20, %v128_v18  ;;  %v139_v23 = vrot.slane %v138_v21, 2 }
 0x125   :  { %v131_v24 = vrot.slane %v130_v22, 1  ;;  %v140_v25 = vadd.f32 %v139_v23, %v138_v21 }
 0x127   :  { %v132_v26 = vadd.f32 %v131_v24, %v130_v22  ;;  %v141_v27 = vrot.slane %v140_v25, 1 }
 0x129   :  { %v134_v28 = vmul.f32 0.125, %v132_v26  ;;  %v142_v29 = vadd.f32 %v141_v27, %v140_v25 }
 0x12b   :  { %v143_v30 = vmul.f32 0.125, %v142_v29  ;;  %v144_v31 = vmul.f32 %v134_v28, %v134_v28 }
 0x12d   :  { %v145_v32 = vsub.f32 %v143_v30, %v144_v31 }
 0x12f   :  { %v147_v33 = vadd.f32 1e-05, %v145_v32 }
 0x131   :  { %312 = vrsqrt.f32 %v147_v33 }
 0x13b   :  { %v313_v38 = vpop.eup %312 }
 0x13c   :  { %v149_v39 = vmul.f32 %v313_v38, %v146_v36 }
 0x13e   :  { %v151_v41 = vmul.f32 %v149_v39, %v134_v28  ;;  %v157_v42 = vrot.slane %v149_v39, %v156_v37 }
 0x140   :  { %v152_v43 = vsub.f32 %v150_v40, %v151_v41  ;;  %v159_v44 = vmul.f32 %v157_v42, %v120_v10 }
 0x142   :  { %v164_v45 = vrot.slane %v152_v43, %v156_v37 }
 0x144   :  { %v166_v46 = vadd.f32 %v164_v45, %v159_v44 }
 0x146   :  { %v167_v47 = vmax.f32 %v166_v46, 0.0 }
 0x148   :  { %v168_v48 = vpack.c.bf16 %v167_v47, %v167_v47 }
 0x14a   :  { %297 = vmatmul.mubr.msk.bf16.vlgmr.msra.gmra.mrb[0].mxu1 %vm76_vm1, %v168_v48 }
 0x21d   :  { %v226_v49 = vpop.f32.mrb[0].mxu1 }
 0x21e   :  { %v232_v50 = vsel %vm76_vm1, %v226_v49, 0.0  ;;  %v240_v51 = vmul.f32 %v226_v49, %v226_v49  ;;  %v298_v52 = vpop.f32.mrb[1].mxu1 }
 0x21f   :  { %v233_v53 = vrot.slane %v232_v50, 4  ;;  %v229_v54 = vpop.f32.mrb[2].mxu1 }
 0x220   :  { %v241_v55 = vsel %vm76_vm1, %v240_v51, 0.0  ;;  %v299_v56 = vpop.f32.mrb[3].mxu1 }
 0x221   :  { %v234_v57 = vadd.f32 %v233_v53, %v232_v50  ;;  %v242_v58 = vrot.slane %v241_v55, 4 }
 0x223   :  { %v235_v59 = vrot.slane %v234_v57, 2  ;;  %v243_v60 = vadd.f32 %v242_v58, %v241_v55 }
 0x225   :  { %v236_v61 = vadd.f32 %v235_v59, %v234_v57  ;;  %v244_v62 = vrot.slane %v243_v60, 2 }
 0x227   :  { %v237_v63 = vrot.slane %v236_v61, 1  ;;  %v245_v0 = vadd.f32 %v244_v62, %v243_v60 }
 0x229   :  { %v238_v1 = vadd.f32 %v237_v63, %v236_v61  ;;  %v246_v2 = vrot.slane %v245_v0, 1 }
 0x22b   :  { %v239_v3 = vmul.f32 0.125, %v238_v1  ;;  %v247_v4 = vadd.f32 %v246_v2, %v245_v0 }
 0x22d   :  { %v248_v5 = vmul.f32 0.125, %v247_v4  ;;  %v249_v6 = vmul.f32 %v239_v3, %v239_v3  ;;  %v251_v9 = vsub.f32 %v226_v49, %v239_v3 }
 0x22f   :  { %v250_v7 = vsub.f32 %v248_v5, %v249_v6 }
 0x231   :  { %v252_v8 = vadd.f32 1e-05, %v250_v7 }
 0x233   :  { %314 = vrsqrt.f32 %v252_v8 }
 0x23d   :  { %v315_v10 = vpop.eup %314 }
 0x23e   :  { %v254_v11 = vmul.f32 %v315_v10, %v251_v9 }
 0x240   :  { %255 = vst.msk [vmem:[#allocation8] sm:$0xff] %vm76_vm1, %v254_v11 }
 0x241   :  { %393 = shalt.err (!%p390_p0)
}
 0x242   :  { %s394_s10 = scalar_lea.hbm %s524_s5, 128 }
 0x243   :  { %p395_p1 = scmp.ne.s32.totalorder %s524_s5, %s394_s10  ;;  %p398_p2 = scmp.lt.u32.totalorder %s394_s10, %s524_s5 }
 0x245   :  { %p400_p3 = pnand %p398_p2, %p395_p1 }
 0x247   :  { %403 = shalt.err (!%p400_p3)
}
 0x248   :  { %265 = dma.vmem_to_hbm [thread:$0]  %s263_s4, 128, %s524_s5, [#allocation4]  }
 0x249   :  { %408 = dma.done.wait [#allocation4], 128  }
 0x24a   :  { %409 = vsyncadd [#allocation4], 4294967168 }
 0x24b   :  { %269 = vsyncpa [#allocation3], 1 }
 0x24c   :  { %270 = vsyncpa [#allocation6], 1 }
 0x24d   :  { %271 = vsyncpa [#allocation4], 1 }

</bundles_post_ra>
